<compile_context>
chip_gen: v5e
topology: v5e:2x2
jax: 0.10.0
libtpu: 0.0.40
codegen_flags: <defaults>
</compile_context>

<pallas_src>
import numpy as np
import jax
import jax.numpy as jnp
from jax.experimental import pallas as pl
from jax.experimental.pallas import tpu as pltpu

# ----- problem sizes (small, consistent with the module: E divisible by 8 heads) -----
L, N, E, H = 8, 2, 32, 8          # seq, batch, embed, heads
DH = E // H                        # head dim
M = L * N                          # flattened rows, row r = l*N + n  (l-major)
HM = H * M                         # blocked attention width (= 128: lane-dense)
EPS = 1e-5                         # nn.LayerNorm default eps
INV_SQRT2 = float(1.0 / np.sqrt(2.0))
assert HM == 128 and M % 8 == 0

# ----- packed-buffer layout (static offsets; column starts are 128-aligned) -----
# wmat: (E, 512) f32
IN_W_OFF, OUT_W_OFF, FF1_W_OFF, FF2_W_OFF, WMAT_COLS = 0, 128, 256, 384, 512
# consts: (HM, 288) f32
BLKSUM_OFF = 0              # cols 0:128   (HM, HM) 0/1 per-head-block row-sum matrix
ADDMASK_OFF = HM            # cols 128:256 rows 0:M   additive same-batch mask (0 / -1e30)
VEC_ROW = M                 # rows M..M+7, same column band: LN weights/biases + linear biases
HEADMASK_OFF = 2 * HM       # cols 256:288 (HM, E) 0/1 head-column selector
CONST_COLS = 2 * HM + E

TRANS_B = (((1,), (1,)), ((), ()))    # A @ B.T contraction for dot_general


def _layernorm(x, w, b):
    mu = jnp.mean(x, axis=-1, keepdims=True)
    var = jnp.mean((x - mu) ** 2, axis=-1, keepdims=True)
    return (x - mu) * jax.lax.rsqrt(var + EPS) * w + b


def _erf(z):
    # Exact-erf GELU path: lax.erf has no guaranteed Mosaic lowering, so use the
    # Abramowitz–Stegun 7.1.26 polynomial (|err| <= 1.5e-7, i.e. f32 round-off
    # level) built only from exp / mul / add / div / where.
    a = jnp.abs(z)
    t = 1.0 / (1.0 + 0.3275911 * a)
    poly = ((((1.061405429 * t - 1.453152027) * t + 1.421413741) * t
             - 0.284496736) * t + 0.254829592) * t
    e = 1.0 - poly * jnp.exp(-a * a)
    return jnp.where(z < 0.0, -e, e)


def _gelu_exact(x):
    return 0.5 * x * (1.0 + _erf(x * INV_SQRT2))


def transformer_block_kernel(x_ref, w_ref, c_ref, o_ref):
    x = x_ref[...]                                            # (M, E) f32
    residual = x

    # ---- unpack packed params / trace-time constants (static VMEM slices) ----
    blocksum  = c_ref[:, BLKSUM_OFF:BLKSUM_OFF + HM]          # (HM, HM)
    addmask   = c_ref[0:M, ADDMASK_OFF:ADDMASK_OFF + HM]      # (M, HM)
    head_mask = c_ref[:, HEADMASK_OFF:HEADMASK_OFF + E]       # (HM, E)
    VC = ADDMASK_OFF
    n1w   = c_ref[VEC_ROW + 0:VEC_ROW + 1, VC:VC + E]
    n1b   = c_ref[VEC_ROW + 1:VEC_ROW + 2, VC:VC + E]
    n2w   = c_ref[VEC_ROW + 2:VEC_ROW + 3, VC:VC + E]
    n2b   = c_ref[VEC_ROW + 3:VEC_ROW + 4, VC:VC + E]
    in_b  = c_ref[VEC_ROW + 4:VEC_ROW + 5, VC:VC + 3 * E]
    out_b = c_ref[VEC_ROW + 5:VEC_ROW + 6, VC:VC + E]
    ff1_b = c_ref[VEC_ROW + 6:VEC_ROW + 7, VC:VC + 4 * E]
    ff2_b = c_ref[VEC_ROW + 7:VEC_ROW + 8, VC:VC + E]

    in_wt  = w_ref[:, IN_W_OFF:IN_W_OFF + 3 * E]              # (E, 3E)  (Q cols pre-scaled)
    out_wt = w_ref[:, OUT_W_OFF:OUT_W_OFF + E]                # (E, E)
    ff1_wt = w_ref[:, FF1_W_OFF:FF1_W_OFF + 4 * E]            # (E, 4E)
    ff2_w  = w_ref[:, FF2_W_OFF:FF2_W_OFF + 4 * E]            # (E, 4E)  PyTorch (out,in)

    # ---------------- norm1 ----------------
    xn = _layernorm(x, n1w, n1b)

    # ---------------- fused QKV projection ----------------
    qkv = jnp.dot(xn, in_wt, preferred_element_type=jnp.float32) + in_b    # (M, 3E)
    q = qkv[:, :E]                       # already scaled by 1/sqrt(DH) via folded weights
    k = qkv[:, E:2 * E]
    v = qkv[:, 2 * E:]

    # ---------------- block-diagonal multi-head attention ----------------
    # Blocked key/value row j = h*M + m holds key/value row m masked to head h's columns.
    krep = jnp.concatenate([k] * H, axis=0)                   # (HM, E)
    vrep = jnp.concatenate([v] * H, axis=0)
    kblk = krep * head_mask
    vblk = vrep * head_mask
    # TODO(synk): block-diagonal trick is toy-size-only (HM=128); at production sizes
    # switch to per-head batched attention + grid to avoid the H x MXU/VMEM blow-up.

    scores = jax.lax.dot_general(q, kblk, TRANS_B,
                                 preferred_element_type=jnp.float32) + addmask  # (M, HM)

    # Softmax per (row, 16-lane head block): row-global max is a valid shift; the
    # per-block denominators come from one (M,HM)x(HM,HM) matmul on the idle MXU.
    scores = scores - jnp.max(scores, axis=-1, keepdims=True)
    p = jnp.exp(scores)                                       # masked lanes -> 0
    denom = jnp.dot(p, blocksum, preferred_element_type=jnp.float32)
    p = p / jnp.maximum(denom, 1e-30)    # exact divide for parity; guard vs. underflow

    ctx = jnp.dot(p, vblk, preferred_element_type=jnp.float32)                # (M, E)
    attn_out = jnp.dot(ctx, out_wt, preferred_element_type=jnp.float32) + out_b

    x = residual + attn_out              # attn dropout + residual dropout: identity (eval)
    residual = x

    # ---------------- norm2 + feed-forward ----------------
    xn = _layernorm(x, n2w, n2b)
    hid = jnp.dot(xn, ff1_wt, preferred_element_type=jnp.float32) + ff1_b     # (M, 4E)
    hid = _gelu_exact(hid)
    f = jax.lax.dot_general(hid, ff2_w, TRANS_B,
                            preferred_element_type=jnp.float32) + ff2_b       # (M, E)

    o_ref[...] = (residual + f).astype(o_ref.dtype)


def make_params(key):
    """Parameters in the PyTorch (out_features, in_features) convention."""
    ks = jax.random.split(key, 8)
    std = 0.02

    def rnd(k, shape):
        return np.array(jax.random.normal(k, shape, jnp.float32)) * std

    return {
        "n1w": np.ones((E,), np.float32), "n1b": np.zeros((E,), np.float32),
        "n2w": np.ones((E,), np.float32), "n2b": np.zeros((E,), np.float32),
        "in_w": rnd(ks[0], (3 * E, E)), "in_b": rnd(ks[1], (3 * E,)),
        "out_w": rnd(ks[2], (E, E)),    "out_b": rnd(ks[3], (E,)),
        "ff1_w": rnd(ks[4], (4 * E, E)), "ff1_b": rnd(ks[5], (4 * E,)),
        "ff2_w": rnd(ks[6], (E, 4 * E)), "ff2_b": rnd(ks[7], (E,)),
    }


def pack_params(p):
    """One-time (offline) packing of all params + trace-time masks into 2 buffers."""
    scale = 1.0 / np.sqrt(DH)
    in_w = np.array(p["in_w"], np.float32).copy()
    in_b = np.array(p["in_b"], np.float32).copy()
    in_w[:E] *= scale                      # fold 1/sqrt(DH) into the Q rows (offline)
    in_b[:E] *= scale

    wmat = np.zeros((E, WMAT_COLS), np.float32)
    wmat[:, IN_W_OFF:IN_W_OFF + 3 * E] = in_w.T            # (E, 3E)
    wmat[:, OUT_W_OFF:OUT_W_OFF + E] = p["out_w"].T        # (E, E)
    wmat[:, FF1_W_OFF:FF1_W_OFF + 4 * E] = p["ff1_w"].T    # (E, 4E)
    wmat[:, FF2_W_OFF:FF2_W_OFF + 4 * E] = p["ff2_w"]      # (E, 4E), contracted on dim 1

    consts = np.zeros((HM, CONST_COLS), np.float32)
    j = np.arange(HM)
    consts[:, BLKSUM_OFF:BLKSUM_OFF + HM] = (j[:, None] // M == j[None, :] // M)
    r = np.arange(M)
    consts[0:M, ADDMASK_OFF:ADDMASK_OFF + HM] = np.where(
        (r[:, None] % N) == (j[None, :] % N), 0.0, -1e30)
    e = np.arange(E)
    consts[:, HEADMASK_OFF:HEADMASK_OFF + E] = (j[:, None] // M == e[None, :] // DH)

    VC = ADDMASK_OFF
    consts[VEC_ROW + 0, VC:VC + E] = p["n1w"]
    consts[VEC_ROW + 1, VC:VC + E] = p["n1b"]
    consts[VEC_ROW + 2, VC:VC + E] = p["n2w"]
    consts[VEC_ROW + 3, VC:VC + E] = p["n2b"]
    consts[VEC_ROW + 4, VC:VC + 3 * E] = in_b
    consts[VEC_ROW + 5, VC:VC + E] = p["out_b"]
    consts[VEC_ROW + 6, VC:VC + 4 * E] = p["ff1_b"]
    consts[VEC_ROW + 7, VC:VC + E] = p["ff2_b"]

    return jnp.asarray(wmat), jnp.asarray(consts)


@jax.jit
def transformer_block(x, wmat, consts):
    # Flatten (L, N, E) -> (L*N, E) once in the wrapper; the kernel is pure 2-D.
    x2d = x.reshape(M, E)
    vmem = pl.BlockSpec(memory_space=pltpu.MemorySpace.VMEM)
    # Gridless on purpose: 16 rows fit one block and the ~0.35 us/step grid overhead
    # would dominate.  At production sizes: add a parallel row grid (uses both v7x
    # TensorCores), bf16 matmul operands with f32 accumulation, a lane-dense output
    # layout, and an explicit vmem_limit_bytes budget (v7x has 64 MiB VMEM).
    out2d = pl.pallas_call(
        transformer_block_kernel,
        out_shape=jax.ShapeDtypeStruct((M, E), x.dtype),
        in_specs=[vmem, vmem, vmem],
        out_specs=vmem,
    )(x2d, wmat, consts)
    return out2d.reshape(L, N, E)


if __name__ == "__main__":
    key = jax.random.PRNGKey(0)
    kx, kp = jax.random.split(key)
    x = jax.random.normal(kx, (L, N, E), jnp.float32)     # (seq, batch, embed)
    params = make_params(kp)
    wmat, consts = pack_params(params)

    out = transformer_block(x, wmat, consts)
    jax.block_until_ready(out)
    assert out.shape == (L, N, E) and out.dtype == jnp.float32
    assert bool(jnp.all(jnp.isfinite(out)))
    print("KERNEL_OK")
</pallas_src>

<mosaic_0001>
module attributes {stable_mosaic.version = 11 : i64} {
  func.func @transformer_block_kernel(%arg0: memref<16x32xf32, #tpu.memory_space<vmem>>, %arg1: memref<32x512xf32, #tpu.memory_space<vmem>>, %arg2: memref<128x288xf32, #tpu.memory_space<vmem>>, %arg3: memref<16x32xf32, #tpu.memory_space<vmem>>) attributes {dimension_semantics = [], scalar_prefetch = 0 : i64, scratch_operands = 0 : i64, tpu.core_type = #tpu.core_type<tc>} {
    %c0 = arith.constant 0 : index
    %c0_0 = arith.constant 0 : index
    %0 = vector.load %arg0[%c0, %c0_0] : memref<16x32xf32, #tpu.memory_space<vmem>>, vector<16x32xf32>
    %c0_1 = arith.constant 0 : index
    %c0_2 = arith.constant 0 : index
    %1 = vector.load %arg2[%c0_1, %c0_2] : memref<128x288xf32, #tpu.memory_space<vmem>>, vector<128x128xf32>
    %c0_3 = arith.constant 0 : index
    %c128 = arith.constant 128 : index
    %2 = vector.load %arg2[%c0_3, %c128] : memref<128x288xf32, #tpu.memory_space<vmem>>, vector<16x128xf32>
    %c0_4 = arith.constant 0 : index
    %c256 = arith.constant 256 : index
    %3 = vector.load %arg2[%c0_4, %c256] : memref<128x288xf32, #tpu.memory_space<vmem>>, vector<128x32xf32>
    %c16 = arith.constant 16 : index
    %c128_5 = arith.constant 128 : index
    %4 = vector.load %arg2[%c16, %c128_5] : memref<128x288xf32, #tpu.memory_space<vmem>>, vector<1x32xf32>
    %c17 = arith.constant 17 : index
    %c128_6 = arith.constant 128 : index
    %5 = vector.load %arg2[%c17, %c128_6] : memref<128x288xf32, #tpu.memory_space<vmem>>, vector<1x32xf32>
    %c18 = arith.constant 18 : index
    %c128_7 = arith.constant 128 : index
    %6 = vector.load %arg2[%c18, %c128_7] : memref<128x288xf32, #tpu.memory_space<vmem>>, vector<1x32xf32>
    %c19 = arith.constant 19 : index
    %c128_8 = arith.constant 128 : index
    %7 = vector.load %arg2[%c19, %c128_8] : memref<128x288xf32, #tpu.memory_space<vmem>>, vector<1x32xf32>
    %c20 = arith.constant 20 : index
    %c128_9 = arith.constant 128 : index
    %8 = vector.load %arg2[%c20, %c128_9] : memref<128x288xf32, #tpu.memory_space<vmem>>, vector<1x96xf32>
    %c21 = arith.constant 21 : index
    %c128_10 = arith.constant 128 : index
    %9 = vector.load %arg2[%c21, %c128_10] : memref<128x288xf32, #tpu.memory_space<vmem>>, vector<1x32xf32>
    %c22 = arith.constant 22 : index
    %c128_11 = arith.constant 128 : index
    %10 = vector.load %arg2[%c22, %c128_11] : memref<128x288xf32, #tpu.memory_space<vmem>>, vector<1x128xf32>
    %c23 = arith.constant 23 : index
    %c128_12 = arith.constant 128 : index
    %11 = vector.load %arg2[%c23, %c128_12] : memref<128x288xf32, #tpu.memory_space<vmem>>, vector<1x32xf32>
    %c0_13 = arith.constant 0 : index
    %c0_14 = arith.constant 0 : index
    %12 = vector.load %arg1[%c0_13, %c0_14] : memref<32x512xf32, #tpu.memory_space<vmem>>, vector<32x96xf32>
    %c0_15 = arith.constant 0 : index
    %c128_16 = arith.constant 128 : index
    %13 = vector.load %arg1[%c0_15, %c128_16] : memref<32x512xf32, #tpu.memory_space<vmem>>, vector<32x32xf32>
    %c0_17 = arith.constant 0 : index
    %c256_18 = arith.constant 256 : index
    %14 = vector.load %arg1[%c0_17, %c256_18] : memref<32x512xf32, #tpu.memory_space<vmem>>, vector<32x128xf32>
    %c0_19 = arith.constant 0 : index
    %c384 = arith.constant 384 : index
    %15 = vector.load %arg1[%c0_19, %c384] : memref<32x512xf32, #tpu.memory_space<vmem>>, vector<32x128xf32>
    %cst = arith.constant dense<0.000000e+00> : vector<16xf32>
    %16 = vector.multi_reduction <add>, %0, %cst [1] : vector<16x32xf32> to vector<16xf32>
    %17 = vector.shape_cast %16 : vector<16xf32> to vector<16x1xf32>
    %cst_20 = arith.constant 3.200000e+01 : f32
    %18 = vector.broadcast %cst_20 : f32 to vector<16x1xf32>
    %19 = arith.divf %17, %18 : vector<16x1xf32>
    %20 = vector.broadcast %19 : vector<16x1xf32> to vector<16x32xf32>
    %21 = arith.subf %0, %20 : vector<16x32xf32>
    %22 = arith.mulf %21, %21 : vector<16x32xf32>
    %cst_21 = arith.constant dense<0.000000e+00> : vector<16xf32>
    %23 = vector.multi_reduction <add>, %22, %cst_21 [1] : vector<16x32xf32> to vector<16xf32>
    %24 = vector.shape_cast %23 : vector<16xf32> to vector<16x1xf32>
    %cst_22 = arith.constant 3.200000e+01 : f32
    %25 = vector.broadcast %cst_22 : f32 to vector<16x1xf32>
    %26 = arith.divf %24, %25 : vector<16x1xf32>
    %27 = vector.broadcast %19 : vector<16x1xf32> to vector<16x32xf32>
    %28 = arith.subf %0, %27 : vector<16x32xf32>
    %cst_23 = arith.constant 9.99999974E-6 : f32
    %29 = vector.broadcast %cst_23 : f32 to vector<16x1xf32>
    %30 = arith.addf %26, %29 : vector<16x1xf32>
    %31 = math.rsqrt %30 : vector<16x1xf32>
    %32 = vector.broadcast %31 : vector<16x1xf32> to vector<16x32xf32>
    %33 = arith.mulf %28, %32 : vector<16x32xf32>
    %34 = vector.broadcast %4 : vector<1x32xf32> to vector<16x32xf32>
    %35 = arith.mulf %33, %34 : vector<16x32xf32>
    %36 = vector.broadcast %5 : vector<1x32xf32> to vector<16x32xf32>
    %37 = arith.addf %35, %36 : vector<16x32xf32>
    %cst_24 = arith.constant dense<0.000000e+00> : vector<16x96xf32>
    %38 = tpu.matmul %37, %12, %cst_24 {dimension_numbers = #tpu.dot_dimension_numbers<[1], [0], [0], [1], [0, 0, 1, 1], [], []>} : vector<16x32xf32>, vector<32x96xf32>, vector<16x96xf32> -> vector<16x96xf32>
    %39 = vector.broadcast %8 : vector<1x96xf32> to vector<16x96xf32>
    %40 = arith.addf %38, %39 : vector<16x96xf32>
    %41 = vector.extract_strided_slice %40 {offsets = [0, 0], sizes = [16, 32], strides = [1, 1]} : vector<16x96xf32> to vector<16x32xf32>
    %42 = vector.extract_strided_slice %40 {offsets = [0, 32], sizes = [16, 32], strides = [1, 1]} : vector<16x96xf32> to vector<16x32xf32>
    %43 = vector.extract_strided_slice %40 {offsets = [0, 64], sizes = [16, 32], strides = [1, 1]} : vector<16x96xf32> to vector<16x32xf32>
    %44 = tpu.concatenate %42, %42, %42, %42, %42, %42, %42, %42 in 0 : vector<16x32xf32>, vector<16x32xf32>, vector<16x32xf32>, vector<16x32xf32>, vector<16x32xf32>, vector<16x32xf32>, vector<16x32xf32>, vector<16x32xf32> -> vector<128x32xf32>
    %45 = tpu.concatenate %43, %43, %43, %43, %43, %43, %43, %43 in 0 : vector<16x32xf32>, vector<16x32xf32>, vector<16x32xf32>, vector<16x32xf32>, vector<16x32xf32>, vector<16x32xf32>, vector<16x32xf32>, vector<16x32xf32> -> vector<128x32xf32>
    %46 = arith.mulf %44, %3 : vector<128x32xf32>
    %47 = arith.mulf %45, %3 : vector<128x32xf32>
    %cst_25 = arith.constant dense<0.000000e+00> : vector<16x128xf32>
    %48 = tpu.matmul %41, %46, %cst_25 {dimension_numbers = #tpu.dot_dimension_numbers<[1], [1], [0], [0], [0, 0, 1, 0], [], []>} : vector<16x32xf32>, vector<128x32xf32>, vector<16x128xf32> -> vector<16x128xf32>
    %49 = arith.addf %48, %2 : vector<16x128xf32>
    %cst_26 = arith.constant dense<0xFF800000> : vector<16xf32>
    %50 = vector.multi_reduction <maximumf>, %49, %cst_26 [1] : vector<16x128xf32> to vector<16xf32>
    %51 = vector.shape_cast %50 : vector<16xf32> to vector<16x1xf32>
    %52 = vector.broadcast %51 : vector<16x1xf32> to vector<16x128xf32>
    %53 = arith.subf %49, %52 : vector<16x128xf32>
    %54 = math.exp %53 : vector<16x128xf32>
    %cst_27 = arith.constant dense<0.000000e+00> : vector<16x128xf32>
    %55 = tpu.matmul %54, %1, %cst_27 {dimension_numbers = #tpu.dot_dimension_numbers<[1], [0], [0], [1], [0, 0, 1, 1], [], []>} : vector<16x128xf32>, vector<128x128xf32>, vector<16x128xf32> -> vector<16x128xf32>
    %cst_28 = arith.constant 1.000000e-30 : f32
    %56 = vector.broadcast %cst_28 : f32 to vector<16x128xf32>
    %57 = arith.maximumf %55, %56 : vector<16x128xf32>
    %58 = arith.divf %54, %57 : vector<16x128xf32>
    %cst_29 = arith.constant dense<0.000000e+00> : vector<16x32xf32>
    %59 = tpu.matmul %58, %47, %cst_29 {dimension_numbers = #tpu.dot_dimension_numbers<[1], [0], [0], [1], [0, 0, 1, 1], [], []>} : vector<16x128xf32>, vector<128x32xf32>, vector<16x32xf32> -> vector<16x32xf32>
    %cst_30 = arith.constant dense<0.000000e+00> : vector<16x32xf32>
    %60 = tpu.matmul %59, %13, %cst_30 {dimension_numbers = #tpu.dot_dimension_numbers<[1], [0], [0], [1], [0, 0, 1, 1], [], []>} : vector<16x32xf32>, vector<32x32xf32>, vector<16x32xf32> -> vector<16x32xf32>
    %61 = vector.broadcast %9 : vector<1x32xf32> to vector<16x32xf32>
    %62 = arith.addf %60, %61 : vector<16x32xf32>
    %63 = arith.addf %0, %62 : vector<16x32xf32>
    %cst_31 = arith.constant dense<0.000000e+00> : vector<16xf32>
    %64 = vector.multi_reduction <add>, %63, %cst_31 [1] : vector<16x32xf32> to vector<16xf32>
    %65 = vector.shape_cast %64 : vector<16xf32> to vector<16x1xf32>
    %cst_32 = arith.constant 3.200000e+01 : f32
    %66 = vector.broadcast %cst_32 : f32 to vector<16x1xf32>
    %67 = arith.divf %65, %66 : vector<16x1xf32>
    %68 = vector.broadcast %67 : vector<16x1xf32> to vector<16x32xf32>
    %69 = arith.subf %63, %68 : vector<16x32xf32>
    %70 = arith.mulf %69, %69 : vector<16x32xf32>
    %cst_33 = arith.constant dense<0.000000e+00> : vector<16xf32>
    %71 = vector.multi_reduction <add>, %70, %cst_33 [1] : vector<16x32xf32> to vector<16xf32>
    %72 = vector.shape_cast %71 : vector<16xf32> to vector<16x1xf32>
    %cst_34 = arith.constant 3.200000e+01 : f32
    %73 = vector.broadcast %cst_34 : f32 to vector<16x1xf32>
    %74 = arith.divf %72, %73 : vector<16x1xf32>
    %75 = vector.broadcast %67 : vector<16x1xf32> to vector<16x32xf32>
    %76 = arith.subf %63, %75 : vector<16x32xf32>
    %cst_35 = arith.constant 9.99999974E-6 : f32
    %77 = vector.broadcast %cst_35 : f32 to vector<16x1xf32>
    %78 = arith.addf %74, %77 : vector<16x1xf32>
    %79 = math.rsqrt %78 : vector<16x1xf32>
    %80 = vector.broadcast %79 : vector<16x1xf32> to vector<16x32xf32>
    %81 = arith.mulf %76, %80 : vector<16x32xf32>
    %82 = vector.broadcast %6 : vector<1x32xf32> to vector<16x32xf32>
    %83 = arith.mulf %81, %82 : vector<16x32xf32>
    %84 = vector.broadcast %7 : vector<1x32xf32> to vector<16x32xf32>
    %85 = arith.addf %83, %84 : vector<16x32xf32>
    %cst_36 = arith.constant dense<0.000000e+00> : vector<16x128xf32>
    %86 = tpu.matmul %85, %14, %cst_36 {dimension_numbers = #tpu.dot_dimension_numbers<[1], [0], [0], [1], [0, 0, 1, 1], [], []>} : vector<16x32xf32>, vector<32x128xf32>, vector<16x128xf32> -> vector<16x128xf32>
    %87 = vector.broadcast %10 : vector<1x128xf32> to vector<16x128xf32>
    %88 = arith.addf %86, %87 : vector<16x128xf32>
    %cst_37 = arith.constant 5.000000e-01 : f32
    %89 = vector.broadcast %cst_37 : f32 to vector<16x128xf32>
    %90 = arith.mulf %89, %88 : vector<16x128xf32>
    %cst_38 = arith.constant 0.707106769 : f32
    %91 = vector.broadcast %cst_38 : f32 to vector<16x128xf32>
    %92 = arith.mulf %88, %91 : vector<16x128xf32>
    %93 = math.absf %92 : vector<16x128xf32>
    %cst_39 = arith.constant 0.327591091 : f32
    %94 = vector.broadcast %cst_39 : f32 to vector<16x128xf32>
    %95 = arith.mulf %94, %93 : vector<16x128xf32>
    %cst_40 = arith.constant 1.000000e+00 : f32
    %96 = vector.broadcast %cst_40 : f32 to vector<16x128xf32>
    %97 = arith.addf %96, %95 : vector<16x128xf32>
    %cst_41 = arith.constant 1.000000e+00 : f32
    %98 = vector.broadcast %cst_41 : f32 to vector<16x128xf32>
    %99 = arith.divf %98, %97 : vector<16x128xf32>
    %cst_42 = arith.constant 1.06140542 : f32
    %100 = vector.broadcast %cst_42 : f32 to vector<16x128xf32>
    %101 = arith.mulf %100, %99 : vector<16x128xf32>
    %cst_43 = arith.constant 1.45315206 : f32
    %102 = vector.broadcast %cst_43 : f32 to vector<16x128xf32>
    %103 = arith.subf %101, %102 : vector<16x128xf32>
    %104 = arith.mulf %103, %99 : vector<16x128xf32>
    %cst_44 = arith.constant 1.42141378 : f32
    %105 = vector.broadcast %cst_44 : f32 to vector<16x128xf32>
    %106 = arith.addf %104, %105 : vector<16x128xf32>
    %107 = arith.mulf %106, %99 : vector<16x128xf32>
    %cst_45 = arith.constant 0.284496725 : f32
    %108 = vector.broadcast %cst_45 : f32 to vector<16x128xf32>
    %109 = arith.subf %107, %108 : vector<16x128xf32>
    %110 = arith.mulf %109, %99 : vector<16x128xf32>
    %cst_46 = arith.constant 0.254829586 : f32
    %111 = vector.broadcast %cst_46 : f32 to vector<16x128xf32>
    %112 = arith.addf %110, %111 : vector<16x128xf32>
    %113 = arith.mulf %112, %99 : vector<16x128xf32>
    %cst_47 = arith.constant 0.000000e+00 : f32
    %114 = vector.broadcast %cst_47 : f32 to vector<16x128xf32>
    %115 = arith.subf %114, %93 : vector<16x128xf32>
    %116 = arith.mulf %115, %93 : vector<16x128xf32>
    %117 = math.exp %116 : vector<16x128xf32>
    %118 = arith.mulf %113, %117 : vector<16x128xf32>
    %cst_48 = arith.constant 1.000000e+00 : f32
    %119 = vector.broadcast %cst_48 : f32 to vector<16x128xf32>
    %120 = arith.subf %119, %118 : vector<16x128xf32>
    %cst_49 = arith.constant 0.000000e+00 : f32
    %121 = vector.broadcast %cst_49 : f32 to vector<16x128xf32>
    %122 = arith.cmpf olt, %92, %121 : vector<16x128xf32>
    %cst_50 = arith.constant 0.000000e+00 : f32
    %123 = vector.broadcast %cst_50 : f32 to vector<16x128xf32>
    %124 = arith.subf %123, %120 : vector<16x128xf32>
    %125 = arith.select %122, %124, %120 : vector<16x128xi1>, vector<16x128xf32>
    %cst_51 = arith.constant 1.000000e+00 : f32
    %126 = vector.broadcast %cst_51 : f32 to vector<16x128xf32>
    %127 = arith.addf %126, %125 : vector<16x128xf32>
    %128 = arith.mulf %90, %127 : vector<16x128xf32>
    %cst_52 = arith.constant dense<0.000000e+00> : vector<16x32xf32>
    %129 = tpu.matmul %128, %15, %cst_52 {dimension_numbers = #tpu.dot_dimension_numbers<[1], [1], [0], [0], [0, 0, 1, 0], [], []>} : vector<16x128xf32>, vector<32x128xf32>, vector<16x32xf32> -> vector<16x32xf32>
    %130 = vector.broadcast %11 : vector<1x32xf32> to vector<16x32xf32>
    %131 = arith.addf %129, %130 : vector<16x32xf32>
    %132 = arith.addf %63, %131 : vector<16x32xf32>
    %c0_53 = arith.constant 0 : index
    %c0_54 = arith.constant 0 : index
    %133 = vector.load %arg3[%c0_53, %c0_54] : memref<16x32xf32, #tpu.memory_space<vmem>>, vector<16x32xf32>
    tpu.vector_store %arg3[%c0_53, %c0_54], %132 {strides = array<i32>} : memref<16x32xf32, #tpu.memory_space<vmem>>, vector<16x32xf32>,
    return
  }
}

</mosaic_0001>

<bundles_post_ra>
// kernel: transformer_block.1
= control target key start
LH: loop header
LB: loop body
LE: loop exit
PB: predicated region body
PF: predicated region fallthrough
CT: control target
= control target key end

     0   :  { %vm75_vm0 = vcmask 261120   ;;  %s1389_s0 = inlined_call_operand.vmem [shape: f32[16,32], index: 0, kind: input, shape index: {}]   ;;  %s1390_s1 = inlined_call_operand.vmem [shape: f32[32,512], index: 1, kind: input, shape index: {}]   ;;  %s1391_s2 = inlined_call_operand.vmem [shape: f32[128,288], index: 2, kind: input, shape index: {}]   ;;  %s1392_s3 = inlined_call_operand.hbm [shape: f32[16,32], index: 3, kind: output, shape index: {}]  }
   0x1   :  { %v955_v0 = vld [vmem:[%s1389_s0] sm:$0xff] }
   0x2   :  { %8 = vsyncpa [#allocation3], 0  ;;  %v76_v1 = vsel %vm75_vm0, %v955_v0, 0.0  ;;  %v962_v2 = vld [vmem:[%s1389_s0 + $0x8] sm:$0xff]  ;;  %v925_v4 = vmov 32.0   ;;  %v62_v21 = vld [vmem:[%s1390_s1 + $0x60] sm:$0xff] }
   0x3   :  { %77 = vadd.xlane.f32.xlu0 %v76_v1  ;;  %v79_v3 = vsel %vm75_vm0, %v962_v2, 0.0  ;;  %873 = vrcp.f32 %v925_v4  ;;  %149 = vmatpush.msra.mxu0 %v62_v21  ;;  %v61_v22 = vld [vmem:[%s1390_s1 + $0x40] sm:$0xff]  ;;  %v990_v24 = vld [vmem:[%s1391_s2 + $0x130] sm:$0xff]  ;;  %s926_s23 = smov 32   ;;  %v1000_v26 = vld [vmem:[%s1391_s2 + $0x178] sm:$0xff]  ;;  %s927_s27 = smov 96  }
   0x4   :  { %v60_v23 = vld [vmem:[%s1390_s1 + $0x20] sm:$0xff]  ;;  %v1005_v27 = vld [vmem:[%s1391_s2 + $0x148] sm:$0xff]  ;;  %206 = vrot.lane.b32.xlu2 %v1000_v26, %s926_s23  ;;  %v1027_v33 = vld [vmem:[%s1391_s2 + $0xd0] sm:$0xff]  ;;  %s929_s21 = smov [#allocation2]   ;;  %s786_s26 = sshll.u32 %s1392_s3, 4  ;;  %s787_s26 = int_to_ptr.hbm [resolvable:$true] %s786_s26 }
   0x5   :  { %150 = vmatpush.msra.mxu0 %v61_v22  ;;  %v59_v25 = vld [vmem:[%s1390_s1] sm:$0xff]  ;;  %v1036_v34 = vld [vmem:[%s1391_s2 + $0x70] sm:$0xff]  ;;  %v1044_v40 = vld [vmem:[%s1391_s2 + $0x118] sm:$0xff]  ;;  %s784_s22 = sshll.u32 %s929_s21, 4  ;;  %s785_s22 = int_to_ptr.vmem [resolvable:$true] %s784_s22 }
   0x6   :  { %v1014_v28 = vld [vmem:[%s1391_s2 + $0xa0] sm:$0xff]  ;;  %v1049_v41 = vld [vmem:[%s1391_s2 + $0x88] sm:$0xff]  ;;  %v51_v51 = vld [vmem:[%s1391_s2 + $0x38] ss:$0 sm:$0xff] }
   0x7   :  { %151 = vmatpush.msra.mxu0 %v60_v23  ;;  %v1022_v32 = vld [vmem:[%s1391_s2 + $0x160] sm:$0xff]  ;;  %v52_v54 = vld [vmem:[%s1391_s2 + $0x39] ss:$0 sm:$0xff]  ;;  %v1071_v59 = vld [vmem:[%s1391_s2 + $0xe8] sm:$0xff] }
   0x8   :  { %v1058_v48 = vld [vmem:[%s1391_s2 + $0x100] sm:$0xff]  ;;  %v1080_v1 = vld [vmem:[%s1391_s2 + $0xb8] sm:$0xff] }
   0x9   :  { %v874_v5 = vpop.eup %873  ;;  %152 = vmatpush.msra.mxu0 %v59_v25 }
   0xa   :  { %v83_v6 = vmul.f32 32.0, %v874_v5  ;;  %vm87_vm1 = vweird.f32 %v874_v5 }
   0xb   :  { %80 = vadd.xlane.f32.xlu0 %v79_v3 }
   0xc   :  { %v84_v7 = vsub.f32 1.0, %v83_v6  ;;  %204 = vrot.lane.b32.xlu2 %v1022_v32, %s926_s23 }
   0xe   :  { %v85_v8 = vmul.f32 %v874_v5, %v84_v7 }
  0x10   :  { %v86_v9 = vadd.f32 %v874_v5, %v85_v8 }
  0x12   :  { %v966_v10 = vsel %vm87_vm1, %v874_v5, %v86_v9  ;;  %v55_v5 = vld [vmem:[%s1391_s2 + $0x3c] ss:$0 sm:$0xff] }
  0x14   :  { %198 = vrot.lane.b32.xlu2 %v1044_v40, %s926_s23 }
  0x1c   :  { %196 = vrot.lane.b32.xlu2 %v1058_v48, %s926_s23 }
  0x1f   :  { %202 = vrot.lane.b32.xlu0 %v1005_v27, %s926_s23 }
  0x24   :  { %194 = vrot.lane.b32.xlu2 %v1071_v59, %s926_s23 }
  0x27   :  { %192 = vrot.lane.b32.xlu0 %v1027_v33, %s926_s23 }
  0x2c   :  { %190 = vrot.lane.b32.xlu2 %v1080_v1, %s926_s23 }
  0x2f   :  { %186 = vrot.lane.b32.xlu0 %v1049_v41, %s926_s23 }
  0x5e   :  { %v207_v3 = vpop.permute.xlu2 %206 }
  0x66   :  { %v205_v4 = vpop.permute.xlu2 %204 }
  0x6e   :  { %v199_v8 = vpop.permute.xlu2 %198 }
  0x76   :  { %v78_v11 = vpop.xlane.xlu0 %77 }
  0x77   :  { %v89_v12 = vmul.f32 %v966_v10, %v78_v11 }
  0x79   :  { %v91_v13 = vsub.f32 %v955_v0, %v89_v12 }
  0x7b   :  { %v93_v14 = vmul.f32 %v91_v13, %v91_v13 }
  0x7d   :  { %v95_v15 = vsel %vm75_vm0, %v93_v14, 0.0  ;;  %v1097_v14 = vld [vmem:[%s1391_s2 + $0x40] sm:$0xff] }
  0x7e   :  { %96 = vadd.xlane.f32.xlu1 %v95_v15  ;;  %v81_v16 = vpop.xlane.xlu0 %80 }
  0x7f   :  { %v90_v17 = vmul.f32 %v966_v10, %v81_v16 }
  0x81   :  { %v973_v18 = vsub.f32 %v962_v2, %v90_v17  ;;  %v197_v17 = vpop.permute.xlu2 %196 }
  0x83   :  { %v94_v19 = vmul.f32 %v973_v18, %v973_v18 }
  0x85   :  { %v98_v20 = vsel %vm75_vm0, %v94_v19, 0.0 }
  0x86   :  { %99 = vadd.xlane.f32.xlu1 %v98_v20  ;;  %v1114_v20 = vld [vmem:[%s1391_s2 + $0x28] sm:$0xff] }
  0x89   :  { %v195_v22 = vpop.permute.xlu2 %194 }
  0x9f   :  { %200 = vrot.lane.b32.xlu1 %v990_v24, %s926_s23 }
  0xa7   :  { %188 = vrot.lane.b32.xlu1 %v1014_v28, %s926_s23 }
  0xaf   :  { %184 = vrot.lane.b32.xlu1 %v1036_v34, %s926_s23 }
  0xf1   :  { %v97_v29 = vpop.xlane.xlu1 %96 }
  0xf2   :  { %v101_v30 = vmul.f32 %v97_v29, %v966_v10 }
  0xf4   :  { %v103_v31 = vadd.f32 1e-05, %v101_v30 }
  0xf6   :  { %875 = vrsqrt.f32 %v103_v31  ;;  %vm111_vm3 = vweird.f32 %v103_v31 }
  0xf9   :  { %v100_v35 = vpop.xlane.xlu1 %99 }
  0xfa   :  { %v102_v36 = vmul.f32 %v100_v35, %v966_v10  ;;  %v1130_v35 = vld [vmem:[%s1391_s2 + $0x10] sm:$0xff] }
  0xfc   :  { %v876_v37 = vpop.eup %875  ;;  %v104_v38 = vadd.f32 1e-05, %v102_v36 }
  0xfd   :  { %v106_v39 = vmul.f32 %v876_v37, %v103_v31  ;;  %vm112_vm2 = vweird.f32 %v876_v37  ;;  %v191_v31 = vpop.permute.xlu2 %190 }
  0xfe   :  { %877 = vrsqrt.f32 %v104_v38  ;;  %vm113_vm4 = vmor %vm111_vm3, %vm112_vm2  ;;  %vm121_vm6 = vweird.f32 %v104_v38 }
  0xff   :  { %v107_v42 = vmul.f32 %v876_v37, %v106_v39 }
 0x101   :  { %v108_v43 = vmul.f32 0.5, %v107_v42 }
 0x103   :  { %v109_v44 = vsub.f32 1.5, %v108_v43 }
 0x104   :  { %v878_v45 = vpop.eup %877 }
 0x105   :  { %v110_v46 = vmul.f32 %v876_v37, %v109_v44  ;;  %v116_v47 = vmul.f32 %v878_v45, %v104_v38  ;;  %vm122_vm5 = vweird.f32 %v878_v45 }
 0x106   :  { %vm123_vm7 = vmor %vm121_vm6, %vm122_vm5 }
 0x107   :  { %v114_v49 = vsel %vm113_vm4, %v876_v37, %v110_v46  ;;  %v117_v50 = vmul.f32 %v878_v45, %v116_v47 }
 0x108   :  { %v125_v52 = vmul.f32 %v114_v49, %v91_v13  ;;  %v203_v13 = vpop.permute.xlu0 %202 }
 0x109   :  { %v118_v53 = vmul.f32 0.5, %v117_v50 }
 0x10a   :  { %v127_v55 = vmul.f32 %v125_v52, %v51_v51 }
 0x10b   :  { %v119_v56 = vsub.f32 1.5, %v118_v53 }
 0x10c   :  { %v129_v57 = vadd.f32 %v127_v55, %v52_v54 }
 0x10d   :  { %v120_v58 = vmul.f32 %v878_v45, %v119_v56 }
 0x10e   :  { %798 = vmatmul.msk.f32.vlgmr.msra.gmra.mxu0 %vm75_vm0, %v129_v57 }
 0x10f   :  { %v124_v60 = vsel %vm123_vm7, %v878_v45, %v120_v58 }
 0x110   :  { %v126_v61 = vmul.f32 %v124_v60, %v973_v18  ;;  %v1108_v18 = vld [vmem:[%s1391_s2 + $0x58] sm:$0xff]  ;;  %v193_v38 = vpop.permute.xlu0 %192 }
 0x111   :  { %v201_v21 = vpop.permute.xlu1 %200 }
 0x112   :  { %v128_v62 = vmul.f32 %v126_v61, %v51_v51 }
 0x114   :  { %v130_v63 = vadd.f32 %v128_v62, %v52_v54 }
 0x116   :  { %799 = vmatmul.msk.f32.gmra.mxu0 %vm75_vm0, %v130_v63 }
 0x118   :  { %v187_v44 = vpop.permute.xlu0 %186 }
 0x119   :  { %v189_v30 = vpop.permute.xlu1 %188 }
 0x121   :  { %v185_v39 = vpop.permute.xlu1 %184 }
 0x18b   :  { %v154_v6 = vpop.f32.mrf.mxu0 }
 0x18c   :  { %v1088_v7 = vadd.f32 %v154_v6, %v55_v5 }
 0x18e   :  { %v238_v9 = vmul.f32 %v205_v4, %v1088_v7  ;;  %v236_v25 = vmul.f32 %v201_v21, %v1088_v7  ;;  %v234_v29 = vmul.f32 %v197_v17, %v1088_v7  ;;  %v230_v36 = vmul.f32 %v189_v30, %v1088_v7 }
 0x18f   :  { %v232_v42 = vmul.f32 %v193_v38, %v1088_v7  ;;  %v228_v43 = vmul.f32 %v185_v39, %v1088_v7  ;;  %v32_v38 = vld [vmem:[%s1391_s2 + $0x168] sm:$0xff]  ;;  %v31_v39 = vld [vmem:[%s1391_s2 + $0x150] sm:$0xff] }
 0x190   :  { %348 = vrot.lane.b32.xlu0 %v238_v9, %s927_s27  ;;  %423 = vmatpush.msra.mxu2 %v32_v38 }
 0x192   :  { %424 = vmatpush.msra.mxu2 %v31_v39 }
 0x193   :  { %v157_v11 = vpop.f32.mrf.mxu0 }
 0x194   :  { %v1092_v12 = vadd.f32 %v157_v11, %v55_v5 }
 0x196   :  { %v239_v15 = vmul.f32 %v207_v3, %v1092_v12  ;;  %v237_v16 = vmul.f32 %v203_v13, %v1092_v12  ;;  %v235_v19 = vmul.f32 %v199_v8, %v1092_v12  ;;  %v233_v23 = vmul.f32 %v195_v22, %v1092_v12 }
 0x197   :  { %v231_v37 = vmul.f32 %v191_v31, %v1092_v12  ;;  %v229_v45 = vmul.f32 %v187_v44, %v1092_v12  ;;  %v34_v31 = vld [vmem:[%s1391_s2 + $0x20] sm:$0xff]  ;;  %v28_v44 = vld [vmem:[%s1391_s2 + $0x108] sm:$0xff] }
 0x198   :  { %180 = vrot.lane.b32.xlu0 %v1097_v14, %s926_s23  ;;  %350 = vrot.lane.b32.xlu2 %v239_v15, %s927_s27 }
 0x199   :  { %346 = vrot.lane.b32.xlu1 %v237_v16, %s927_s27 }
 0x1a0   :  { %182 = vrot.lane.b32.xlu2 %v1108_v18, %s926_s23  ;;  %342 = vrot.lane.b32.xlu0 %v235_v19, %s927_s27 }
 0x1a1   :  { %178 = vrot.lane.b32.xlu1 %v1114_v20, %s926_s23 }
 0x1a8   :  { %338 = vrot.lane.b32.xlu0 %v233_v23, %s927_s27  ;;  %344 = vrot.lane.b32.xlu2 %v236_v25, %s927_s27  ;;  %v33_v25 = vld [vmem:[%s1391_s2 + $0x8] sm:$0xff] }
 0x1a9   :  { %340 = vrot.lane.b32.xlu1 %v234_v29, %s927_s27 }
 0x1b0   :  { %176 = vrot.lane.b32.xlu2 %v1130_v35, %s926_s23  ;;  %332 = vrot.lane.b32.xlu0 %v230_v36, %s927_s27  ;;  %s928_s23 = smov 64  }
 0x1b1   :  { %334 = vrot.lane.b32.xlu1 %v231_v37, %s927_s27 }
 0x1b8   :  { %336 = vrot.lane.b32.xlu2 %v232_v42, %s927_s27  ;;  %v30_v42 = vld [vmem:[%s1391_s2 + $0x138] sm:$0xff] }
 0x1b9   :  { %328 = vrot.lane.b32.xlu1 %v228_v43, %s927_s27  ;;  %v29_v43 = vld [vmem:[%s1391_s2 + $0x120] sm:$0xff]  ;;  %425 = vmatpush.msra.mxu2 %v30_v42 }
 0x1bb   :  { %426 = vmatpush.msra.mxu2 %v29_v43 }
 0x1bd   :  { %427 = vmatpush.msra.mxu2 %v28_v44 }
 0x1c0   :  { %330 = vrot.lane.b32.xlu2 %v229_v45, %s927_s27  ;;  %v27_v45 = vld [vmem:[%s1391_s2 + $0xf0] sm:$0xff] }
 0x1c1   :  { %428 = vmatpush.msra.mxu2 %v27_v45 }
 0x1f2   :  { %v351_v46 = vpop.permute.xlu2 %350 }
 0x1f3   :  { %800 = vmatpush.xpose.msk.msra.mxu1 %vm75_vm0, %v351_v46  ;;  %v26_v46 = vld [vmem:[%s1391_s2 + $0xd8] sm:$0xff] }
 0x1f4   :  { %429 = vmatpush.msra.mxu2 %v26_v46 }
 0x1fa   :  { %v183_v47 = vpop.permute.xlu2 %182 }
 0x1fb   :  { %v227_v49 = vmul.f32 %v183_v47, %v1092_v12  ;;  %v25_v47 = vld [vmem:[%s1391_s2 + $0xc0] sm:$0xff] }
 0x1fc   :  { %430 = vmatpush.msra.mxu2 %v25_v47 }
 0x1fd   :  { %326 = vrot.lane.b32.xlu0 %v227_v49, %s927_s27  ;;  %v23_v49 = vld [vmem:[%s1391_s2 + $0x90] sm:$0xff] }
 0x202   :  { %v345_v50 = vpop.permute.xlu2 %344  ;;  %v349_v51 = vpop.permute.xlu0 %348 }
 0x203   :  { %801 = vmatpush.xpose.msk.msra.mxu1 %vm75_vm0, %v349_v51 }
 0x20a   :  { %v177_v52 = vpop.permute.xlu2 %176  ;;  %v181_v53 = vpop.permute.xlu0 %180 }
 0x20b   :  { %v224_v54 = vmul.f32 %v177_v52, %v1088_v7  ;;  %v347_v55 = vpop.permute.xlu1 %346  ;;  %v226_v56 = vmul.f32 %v181_v53, %v1088_v7 }
 0x20c   :  { %802 = vmatpush.xpose.msk.msra.mxu1 %vm75_vm0, %v347_v55 }
 0x20d   :  { %320 = vrot.lane.b32.xlu0 %v224_v54, %s927_s27  ;;  %324 = vrot.lane.b32.xlu2 %v226_v56, %s927_s27 }
 0x210   :  { %803 = vmatpush.xpose.msk.msra.mxu1 %vm75_vm0, %v345_v50  ;;  %v17_v50 = vld [vmem:[%s1391_s2] sm:$0xff] }
 0x212   :  { %v343_v57 = vpop.permute.xlu0 %342  ;;  %v337_v63 = vpop.permute.xlu2 %336 }
 0x213   :  { %v179_v58 = vpop.permute.xlu1 %178 }
 0x214   :  { %v225_v60 = vmul.f32 %v179_v58, %v1092_v12  ;;  %804 = vmatpush.xpose.msk.msra.mxu1 %vm75_vm0, %v343_v57 }
 0x215   :  { %270 = vrot.lane.b32.xlu0 %v1000_v26, %s928_s23 }
 0x216   :  { %322 = vrot.lane.b32.xlu1 %v225_v60, %s927_s27  ;;  %s931_s27 = smov 8  }
 0x21a   :  { %v339_v62 = vpop.permute.xlu0 %338  ;;  %v331_v4 = vpop.permute.xlu2 %330 }
 0x21b   :  { %v341_v61 = vpop.permute.xlu1 %340 }
 0x21c   :  { %805 = vmatpush.xpose.msk.msra.mxu1 %vm75_vm0, %v341_v61 }
 0x21d   :  { %268 = vrot.lane.b32.xlu0 %v1022_v32, %s928_s23 }
 0x220   :  { %806 = vmatpush.xpose.msk.msra.mxu1 %vm75_vm0, %v339_v62 }
 0x222   :  { %v333_v26 = vpop.permute.xlu0 %332 }
 0x223   :  { %v335_v3 = vpop.permute.xlu1 %334 }
 0x224   :  { %807 = vmatpush.xpose.msk.msra.mxu1 %vm75_vm0, %v337_v63 }
 0x225   :  { %266 = vrot.lane.b32.xlu0 %v1005_v27, %s928_s23 }
 0x228   :  { %808 = vmatpush.xpose.msk.msra.mxu1 %vm75_vm0, %v335_v3 }
 0x22b   :  { %v329_v32 = vpop.permute.xlu1 %328 }
 0x22c   :  { %809 = vmatpush.xpose.msk.msra.mxu1 %vm75_vm0, %v333_v26 }
 0x22d   :  { %264 = vrot.lane.b32.xlu0 %v990_v24, %s928_s23 }
 0x230   :  { %810 = vmatpush.xpose.msk.msra.mxu1 %vm75_vm0, %v331_v4 }
 0x234   :  { %811 = vmatpush.xpose.msk.msra.mxu1 %vm75_vm0, %v329_v32 }
 0x235   :  { %262 = vrot.lane.b32.xlu0 %v1044_v40, %s928_s23 }
 0x23d   :  { %256 = vrot.lane.b32.xlu0 %v1027_v33, %s928_s23 }
 0x245   :  { %254 = vrot.lane.b32.xlu0 %v1080_v1, %s928_s23 }
 0x24d   :  { %252 = vrot.lane.b32.xlu0 %v1014_v28, %s928_s23 }
 0x255   :  { %248 = vrot.lane.b32.xlu0 %v1036_v34, %s928_s23 }
 0x25d   :  { %242 = vrot.lane.b32.xlu0 %v1114_v20, %s928_s23 }
 0x267   :  { %v325_v27 = vpop.permute.xlu2 %324 }
 0x26f   :  { %v327_v24 = vpop.permute.xlu0 %326 }
 0x270   :  { %812 = vmatpush.xpose.msk.msra.mxu1 %vm75_vm0, %v327_v24 }
 0x274   :  { %813 = vmatpush.xpose.msk.msra.mxu1 %vm75_vm0, %v325_v27 }
 0x27f   :  { %v321_v40 = vpop.permute.xlu0 %320 }
 0x287   :  { %v271_v33 = vpop.permute.xlu0 %270 }
 0x288   :  { %v323_v5 = vpop.permute.xlu1 %322  ;;  %v303_v1 = vmul.f32 %v271_v33, %v1092_v12 }
 0x289   :  { %814 = vmatpush.xpose.msk.msra.mxu1 %vm75_vm0, %v323_v5 }
 0x28d   :  { %815 = vmatpush.xpose.msk.msra.mxu1 %vm75_vm0, %v321_v40 }
 0x28f   :  { %v269_v28 = vpop.permute.xlu0 %268 }
 0x290   :  { %816 = vmatmul.msk.f32.vlgmr.msra.gmra.mxu1 %vm75_vm0, %v1088_v7  ;;  %v302_v34 = vmul.f32 %v269_v28, %v1088_v7 }
 0x292   :  { %v833_v6 = vpack.i.bf16 %v302_v34, %v303_v1 }
 0x297   :  { %v267_v8 = vpop.permute.xlu0 %266 }
 0x298   :  { %817 = vmatmul.msk.f32.gmra.mxu1 %vm75_vm0, %v1092_v12  ;;  %v301_v11 = vmul.f32 %v267_v8, %v1092_v12 }
 0x29f   :  { %v265_v9 = vpop.permute.xlu0 %264 }
 0x2a0   :  { %v300_v13 = vmul.f32 %v265_v9, %v1088_v7 }
 0x2a2   :  { %v838_v15 = vpack.i.bf16 %v300_v13, %v301_v11 }
 0x2a4   :  { %839 = vrot.lane.b32.xlu0 %v838_v15, %s928_s23 }
 0x2a7   :  { %v263_v16 = vpop.permute.xlu0 %262 }
 0x2a8   :  { %v299_v56 = vmul.f32 %v263_v16, %v1092_v12 }
 0x2af   :  { %v1197_v17 = vpop.permute.xlu0 %256 }
 0x2b0   :  { %v296_v28 = vmul.f32 %v1197_v17, %v1088_v7 }
 0x2b7   :  { %v255_v19 = vpop.permute.xlu0 %254 }
 0x2b8   :  { %v295_v21 = vmul.f32 %v255_v19, %v1092_v12 }
 0x2bf   :  { %v253_v20 = vpop.permute.xlu0 %252 }
 0x2c0   :  { %v294_v22 = vmul.f32 %v253_v20, %v1088_v7 }
 0x2c2   :  { %v853_v23 = vpack.i.bf16 %v294_v22, %v295_v21 }
 0x2c4   :  { %854 = vrot.lane.b32.xlu0 %v853_v23, %s928_s23 }
 0x2c7   :  { %v249_v63 = vpop.permute.xlu0 %248 }
 0x2c8   :  { %v292_v26 = vmul.f32 %v249_v63, %v1088_v7 }
 0x2cf   :  { %v243_v40 = vpop.permute.xlu0 %242 }
 0x2d0   :  { %v289_v21 = vmul.f32 %v243_v40, %v1092_v12 }
 0x30d   :  { %v407_v29 = vpop.f32.mrf.mxu1 }
 0x30e   :  { %v408_v30 = vadd.f32 %v407_v29, %v33_v25 }
 0x310   :  { %413 = vmax.xlane.f32.xlu2 %v408_v30 }
 0x315   :  { %v410_v36 = vpop.f32.mrf.mxu1 }
 0x316   :  { %v411_v37 = vadd.f32 %v410_v36, %v34_v31 }
 0x318   :  { %415 = vmax.xlane.f32.xlu1 %v411_v37 }
 0x328   :  { %260 = vrot.lane.b32.xlu2 %v1058_v48, %s928_s23  ;;  %v24_v48 = vld [vmem:[%s1391_s2 + $0xa8] sm:$0xff] }
 0x329   :  { %431 = vmatpush.msra.mxu2 %v24_v48 }
 0x32b   :  { %432 = vmatpush.msra.mxu2 %v23_v49  ;;  %v66_v49 = vld [vmem:[%s1390_s1 + $0x68] sm:$0xff] }
 0x32c   :  { %583 = vmatpush.msrb.mxu0 %v66_v49 }
 0x330   :  { %250 = vrot.lane.b32.xlu2 %v1049_v41, %s928_s23  ;;  %v22_v41 = vld [vmem:[%s1391_s2 + $0x78] sm:$0xff] }
 0x331   :  { %258 = vrot.lane.b32.xlu1 %v1071_v59, %s928_s23  ;;  %433 = vmatpush.msra.mxu2 %v22_v41  ;;  %v21_v59 = vld [vmem:[%s1391_s2 + $0x60] sm:$0xff]  ;;  %v65_v41 = vld [vmem:[%s1390_s1 + $0x48] sm:$0xff] }
 0x332   :  { %584 = vmatpush.msrb.mxu0 %v65_v41 }
 0x333   :  { %434 = vmatpush.msra.mxu2 %v21_v59 }
 0x338   :  { %244 = vrot.lane.b32.xlu2 %v1097_v14, %s928_s23  ;;  %v20_v14 = vld [vmem:[%s1391_s2 + $0x48] sm:$0xff] }
 0x339   :  { %246 = vrot.lane.b32.xlu1 %v1108_v18, %s928_s23  ;;  %435 = vmatpush.msra.mxu2 %v20_v14  ;;  %v19_v18 = vld [vmem:[%s1391_s2 + $0x30] sm:$0xff]  ;;  %v64_v14 = vld [vmem:[%s1390_s1 + $0x28] sm:$0xff] }
 0x33a   :  { %585 = vmatpush.msrb.mxu0 %v64_v14 }
 0x33b   :  { %436 = vmatpush.msra.mxu2 %v19_v18 }
 0x340   :  { %834 = vrot.lane.b32.xlu2 %v833_v6, %s928_s23  ;;  %v840_v6 = vpop.permute.xlu0 %839 }
 0x341   :  { %240 = vrot.lane.b32.xlu1 %v1130_v35, %s928_s23  ;;  %v18_v35 = vld [vmem:[%s1391_s2 + $0x18] sm:$0xff]  ;;  %v841_v11 = vunpack.i.l.bf16 %v840_v6  ;;  %v842_v13 = vunpack.i.h.bf16 %v840_v6 }
 0x342   :  { %437 = vmatpush.msra.mxu2 %v18_v35 }
 0x344   :  { %438 = vmatpush.msra.mxu2 %v17_v50 }
 0x383   :  { %v414_v51 = vpop.xlane.xlu2 %413 }
 0x384   :  { %v417_v52 = vsub.f32 %v408_v30, %v414_v51  ;;  %v63_v51 = vld [vmem:[%s1390_s1 + $0x8] sm:$0xff] }
 0x385   :  { %586 = vmatpush.msrb.mxu0 %v63_v51  ;;  %v53_v51 = vld [vmem:[%s1391_s2 + $0x3a] ss:$0 sm:$0xff] }
 0x386   :  { %v419_v53 = vmul.f32 1.442695, %v417_v52 }
 0x388   :  { %879 = vpow2.f32 %v419_v53 }
 0x38b   :  { %v416_v54 = vpop.xlane.xlu1 %415  ;;  %v261_v55 = vpop.permute.xlu2 %260 }
 0x38c   :  { %v418_v57 = vsub.f32 %v411_v37, %v416_v54  ;;  %v298_v58 = vmul.f32 %v261_v55, %v1088_v7  ;;  %v855_v37 = vpop.permute.xlu0 %854 }
 0x38d   :  { %v856_v39 = vunpack.i.l.bf16 %v855_v37 }
 0x38e   :  { %v1271_v60 = vpop.eup %879  ;;  %v421_v61 = vmul.f32 1.442695, %v418_v57  ;;  %v843_v62 = vpack.i.bf16 %v298_v58, %v299_v56 }
 0x38f   :  { %439 = vmatmul.f32.vlgmr.msra.gmra.mxu2 %v1271_v60 }
 0x390   :  { %881 = vpow2.f32 %v421_v61  ;;  %844 = vrot.lane.b32.xlu1 %v843_v62, %s928_s23 }
 0x393   :  { %v251_v3 = vpop.permute.xlu2 %250 }
 0x394   :  { %v293_v4 = vmul.f32 %v251_v3, %v1092_v12 }
 0x396   :  { %v1277_v32 = vpop.eup %881  ;;  %v858_v24 = vpack.i.bf16 %v292_v26, %v293_v4 }
 0x397   :  { %442 = vmatmul.f32.gmra.mxu2 %v1277_v32 }
 0x398   :  { %859 = vrot.lane.b32.xlu1 %v858_v24, %s928_s23 }
 0x39b   :  { %v245_v27 = vpop.permute.xlu2 %244 }
 0x39c   :  { %v290_v16 = vmul.f32 %v245_v27, %v1088_v7 }
 0x3a3   :  { %v259_v33 = vpop.permute.xlu1 %258  ;;  %v835_v5 = vpop.permute.xlu2 %834 }
 0x3a4   :  { %v297_v1 = vmul.f32 %v259_v33, %v1092_v12  ;;  %v836_v34 = vunpack.i.l.bf16 %v835_v5  ;;  %v837_v9 = vunpack.i.h.bf16 %v835_v5 }
 0x3a6   :  { %v848_v8 = vpack.i.bf16 %v296_v28, %v297_v1  ;;  %542 = vmatpush.msra.mxu3 %v836_v34 }
 0x3a8   :  { %543 = vmatpush.msra.mxu3 %v837_v9  ;;  %849 = vrot.lane.b32.xlu2 %v848_v8, %s928_s23 }
 0x3aa   :  { %544 = vmatpush.msra.mxu3 %v841_v11 }
 0x3ab   :  { %v247_v15 = vpop.permute.xlu1 %246 }
 0x3ac   :  { %v291_v19 = vmul.f32 %v247_v15, %v1092_v12  ;;  %545 = vmatpush.msra.mxu3 %v842_v13  ;;  %v857_v12 = vunpack.i.h.bf16 %v855_v37 }
 0x3ae   :  { %v863_v17 = vpack.i.bf16 %v290_v16, %v291_v19 }
 0x3b0   :  { %864 = vrot.lane.b32.xlu2 %v863_v17, %s928_s23 }
 0x3b3   :  { %v241_v20 = vpop.permute.xlu1 %240 }
 0x3b4   :  { %v288_v22 = vmul.f32 %v241_v20, %v1088_v7 }
 0x3b6   :  { %v868_v23 = vpack.i.bf16 %v288_v22, %v289_v21 }
 0x3b8   :  { %869 = vrot.lane.b32.xlu0 %v868_v23, %s928_s23 }
 0x402   :  { %v845_v25 = vpop.permute.xlu1 %844  ;;  %v850_v30 = vpop.permute.xlu2 %849 }
 0x403   :  { %v846_v29 = vunpack.i.l.bf16 %v845_v25  ;;  %v847_v31 = vunpack.i.h.bf16 %v845_v25  ;;  %v851_v36 = vunpack.i.l.bf16 %v850_v30  ;;  %v852_v38 = vunpack.i.h.bf16 %v850_v30 }
 0x405   :  { %546 = vmatpush.msra.mxu3 %v846_v29 }
 0x407   :  { %547 = vmatpush.msra.mxu3 %v847_v31 }
 0x409   :  { %548 = vmatpush.msra.mxu3 %v851_v36 }
 0x40a   :  { %v860_v42 = vpop.permute.xlu1 %859  ;;  %v865_v43 = vpop.permute.xlu2 %864 }
 0x40b   :  { %549 = vmatpush.msra.mxu3 %v852_v38  ;;  %v861_v7 = vunpack.i.l.bf16 %v860_v42  ;;  %v862_v44 = vunpack.i.h.bf16 %v860_v42  ;;  %v866_v47 = vunpack.i.l.bf16 %v865_v43  ;;  %v867_v48 = vunpack.i.h.bf16 %v865_v43  ;;  %v70_v38 = vld [vmem:[%s1390_s1 + $0x70] sm:$0xff] }
 0x40c   :  { %662 = vmatpush.msra.mxu0 %v70_v38  ;;  %v68_v42 = vld [vmem:[%s1390_s1 + $0x30] sm:$0xff] }
 0x40d   :  { %550 = vmatpush.msra.mxu3 %v856_v39  ;;  %v69_v39 = vld [vmem:[%s1390_s1 + $0x50] sm:$0xff] }
 0x40e   :  { %663 = vmatpush.msra.mxu0 %v69_v39 }
 0x40f   :  { %551 = vmatpush.msra.mxu3 %v857_v12  ;;  %v67_v12 = vld [vmem:[%s1390_s1 + $0x10] sm:$0xff] }
 0x410   :  { %664 = vmatpush.msra.mxu0 %v68_v42 }
 0x411   :  { %552 = vmatpush.msra.mxu3 %v861_v7 }
 0x412   :  { %v440_v45 = vpop.f32.mrf.mxu2  ;;  %665 = vmatpush.msra.mxu0 %v67_v12 }
 0x413   :  { %v446_v46 = vmax.f32 %v440_v45, 1e-30  ;;  %553 = vmatpush.msra.mxu3 %v862_v44 }
 0x415   :  { %883 = vrcp.f32 %v446_v46  ;;  %554 = vmatpush.msra.mxu3 %v866_v47  ;;  %v459_v57 = vand.u32 2147483648, %v446_v46  ;;  %vm453_vm9 = vweird.f32 %v446_v46  ;;  %v457_v58 = vand.u32 2147483647, %v446_v46 }
 0x417   :  { %555 = vmatpush.msra.mxu3 %v867_v48  ;;  %v460_v3 = vor.u32 1.1754944e-38, %v459_v57  ;;  %vm458_vm11 = vcmp.eq.f32.partialorder %v457_v58, 8.507059e+37 }
 0x41a   :  { %v443_v59 = vpop.f32.mrf.mxu2 }
 0x41b   :  { %v884_v18 = vpop.eup %883  ;;  %v447_v35 = vmax.f32 %v443_v59, 1e-30 }
 0x41c   :  { %v449_v50 = vmul.f32 %v884_v18, %v446_v46  ;;  %vm454_vm8 = vweird.f32 %v884_v18 }
 0x41d   :  { %885 = vrcp.f32 %v447_v35  ;;  %vm455_vm10 = vmor %vm453_vm9, %vm454_vm8  ;;  %v474_v33 = vand.u32 2147483648, %v447_v35  ;;  %vm468_vm13 = vweird.f32 %v447_v35  ;;  %v472_v28 = vand.u32 2147483647, %v447_v35 }
 0x41e   :  { %v450_v52 = vsub.f32 1.0, %v449_v50 }
 0x41f   :  { %v475_v34 = vor.u32 1.1754944e-38, %v474_v33  ;;  %vm473_vm15 = vcmp.eq.f32.partialorder %v472_v28, 8.507059e+37  ;;  %v73_v33 = vld [vmem:[%s1390_s1 + $0x58] sm:$0xff] }
 0x420   :  { %v451_v53 = vmul.f32 %v884_v18, %v450_v52 }
 0x422   :  { %v452_v56 = vadd.f32 %v884_v18, %v451_v53 }
 0x423   :  { %v886_v54 = vpop.eup %885 }
 0x424   :  { %v464_v55 = vmul.f32 %v886_v54, %v447_v35  ;;  %v456_v62 = vsel %vm455_vm10, %v884_v18, %v452_v56  ;;  %vm469_vm12 = vweird.f32 %v886_v54 }
 0x425   :  { %v461_v24 = vsel %vm458_vm11, %v460_v3, %v456_v62  ;;  %vm470_vm14 = vmor %vm468_vm13, %vm469_vm12 }
 0x426   :  { %v465_v61 = vsub.f32 1.0, %v464_v55  ;;  %v462_v5 = vmul.f32 %v1271_v60, %v461_v24  ;;  %v56_v60 = vld [vmem:[%s1391_s2 + $0x3d] ss:$0 sm:$0xff]  ;;  %v54_v55 = vld [vmem:[%s1391_s2 + $0x3b] ss:$0 sm:$0xff] }
 0x427   :  { %v74_v24 = vld [vmem:[%s1390_s1 + $0x78] sm:$0xff] }
 0x428   :  { %v466_v63 = vmul.f32 %v886_v54, %v465_v61  ;;  %765 = vmatpush.xpose.msrb.mxu2 %v74_v24 }
 0x42a   :  { %v870_v26 = vpop.permute.xlu0 %869  ;;  %v467_v27 = vadd.f32 %v886_v54, %v466_v63 }
 0x42b   :  { %v871_v4 = vunpack.i.l.bf16 %v870_v26  ;;  %v872_v40 = vunpack.i.h.bf16 %v870_v26 }
 0x42c   :  { %v471_v1 = vsel %vm470_vm14, %v886_v54, %v467_v27  ;;  %766 = vmatpush.xpose.msrb.mxu2 %v73_v33 }
 0x42d   :  { %556 = vmatpush.msra.mxu3 %v871_v4  ;;  %v476_v6 = vsel %vm473_vm15, %v475_v34, %v471_v1  ;;  %v57_v4 = vld [vmem:[%s1391_s2 + $0x3e] ss:$0 sm:$0xff] }
 0x42e   :  { %v477_v8 = vmul.f32 %v1277_v32, %v476_v6  ;;  %v72_v1 = vld [vmem:[%s1390_s1 + $0x38] sm:$0xff] }
 0x42f   :  { %557 = vmatpush.msra.mxu3 %v872_v40 }
 0x430   :  { %558 = vmatmul.f32.vlgmr.msra.gmra.mxu3 %v462_v5  ;;  %767 = vmatpush.xpose.msrb.mxu2 %v72_v1 }
 0x438   :  { %561 = vmatmul.f32.gmra.mxu3 %v477_v8 }
 0x4b3   :  { %v559_v9 = vpop.f32.mrf.mxu3 }
 0x4b4   :  { %818 = vmatmul.msk.f32.vlgmr.msrb.gmra.mxu0 %vm75_vm0, %v559_v9 }
 0x4bb   :  { %v562_v11 = vpop.f32.mrf.mxu3 }
 0x4bc   :  { %819 = vmatmul.msk.f32.gmra.mxu0 %vm75_vm0, %v562_v11  ;;  %v71_v11 = vld [vmem:[%s1390_s1 + $0x18] sm:$0xff] }
 0x4bd   :  { %768 = vmatpush.xpose.msrb.mxu2 %v71_v11 }
 0x531   :  { %v588_v13 = vpop.f32.mrf.mxu0 }
 0x532   :  { %v589_v15 = vadd.f32 %v588_v13, %v56_v60 }
 0x534   :  { %v1311_v16 = vadd.f32 %v589_v15, %v955_v0 }
 0x536   :  { %v596_v19 = vsel %vm75_vm0, %v1311_v16, 0.0 }
 0x537   :  { %597 = vadd.xlane.f32.xlu1 %v596_v19 }
 0x539   :  { %v591_v32 = vpop.f32.mrf.mxu0 }
 0x53a   :  { %v592_v17 = vadd.f32 %v591_v32, %v56_v60 }
 0x53c   :  { %v1316_v20 = vadd.f32 %v592_v17, %v962_v2 }
 0x53e   :  { %v599_v21 = vsel %vm75_vm0, %v1316_v20, 0.0 }
 0x53f   :  { %600 = vadd.xlane.f32.xlu2 %v599_v21 }
 0x5aa   :  { %v598_v22 = vpop.xlane.xlu1 %597 }
 0x5ab   :  { %v602_v23 = vmul.f32 %v598_v22, %v966_v10 }
 0x5ad   :  { %v604_v25 = vsub.f32 %v1311_v16, %v602_v23 }
 0x5af   :  { %v606_v0 = vmul.f32 %v604_v25, %v604_v25 }
 0x5b1   :  { %v608_v29 = vsel %vm75_vm0, %v606_v0, 0.0 }
 0x5b2   :  { %609 = vadd.xlane.f32.xlu0 %v608_v29  ;;  %v601_v30 = vpop.xlane.xlu2 %600 }
 0x5b3   :  { %v603_v31 = vmul.f32 %v601_v30, %v966_v10 }
 0x5b5   :  { %v605_v36 = vsub.f32 %v1316_v20, %v603_v31 }
 0x5b7   :  { %v607_v2 = vmul.f32 %v605_v36, %v605_v36 }
 0x5b9   :  { %v611_v37 = vsel %vm75_vm0, %v607_v2, 0.0 }
 0x5ba   :  { %612 = vadd.xlane.f32.xlu1 %v611_v37 }
 0x625   :  { %v610_v7 = vpop.xlane.xlu0 %609 }
 0x626   :  { %v614_v43 = vmul.f32 %v610_v7, %v966_v10 }
 0x628   :  { %v616_v44 = vadd.f32 1e-05, %v614_v43 }
 0x62a   :  { %887 = vrsqrt.f32 %v616_v44  ;;  %vm624_vm2 = vweird.f32 %v616_v44 }
 0x62d   :  { %v613_v45 = vpop.xlane.xlu1 %612 }
 0x62e   :  { %v615_v46 = vmul.f32 %v613_v45, %v966_v10 }
 0x630   :  { %v888_v47 = vpop.eup %887  ;;  %v617_v48 = vadd.f32 1e-05, %v615_v46 }
 0x631   :  { %v619_v49 = vmul.f32 %v888_v47, %v616_v44  ;;  %vm625_vm1 = vweird.f32 %v888_v47 }
 0x632   :  { %889 = vrsqrt.f32 %v617_v48  ;;  %vm626_vm3 = vmor %vm624_vm2, %vm625_vm1  ;;  %vm634_vm5 = vweird.f32 %v617_v48 }
 0x633   :  { %v620_v41 = vmul.f32 %v888_v47, %v619_v49 }
 0x635   :  { %v621_v59 = vmul.f32 0.5, %v620_v41 }
 0x637   :  { %v622_v14 = vsub.f32 1.5, %v621_v59 }
 0x638   :  { %v890_v18 = vpop.eup %889 }
 0x639   :  { %v623_v35 = vmul.f32 %v888_v47, %v622_v14  ;;  %v629_v50 = vmul.f32 %v890_v18, %v617_v48  ;;  %vm635_vm4 = vweird.f32 %v890_v18 }
 0x63a   :  { %vm636_vm6 = vmor %vm634_vm5, %vm635_vm4 }
 0x63b   :  { %v627_v52 = vsel %vm626_vm3, %v888_v47, %v623_v35  ;;  %v630_v53 = vmul.f32 %v890_v18, %v629_v50 }
 0x63c   :  { %v638_v10 = vmul.f32 %v627_v52, %v604_v25 }
 0x63d   :  { %v631_v54 = vmul.f32 0.5, %v630_v53 }
 0x63e   :  { %v640_v56 = vmul.f32 %v638_v10, %v53_v51 }
 0x63f   :  { %v632_v57 = vsub.f32 1.5, %v631_v54 }
 0x640   :  { %v642_v58 = vadd.f32 %v640_v56, %v54_v55 }
 0x641   :  { %v633_v61 = vmul.f32 %v890_v18, %v632_v57 }
 0x642   :  { %820 = vmatmul.msk.f32.vlgmr.msra.gmra.mxu0 %vm75_vm0, %v642_v58 }
 0x643   :  { %v637_v62 = vsel %vm636_vm6, %v890_v18, %v633_v61 }
 0x644   :  { %v639_v63 = vmul.f32 %v637_v62, %v605_v36 }
 0x646   :  { %v641_v3 = vmul.f32 %v639_v63, %v53_v51 }
 0x648   :  { %v643_v26 = vadd.f32 %v641_v3, %v54_v55 }
 0x64a   :  { %821 = vmatmul.msk.f32.gmra.mxu0 %vm75_vm0, %v643_v26 }
 0x6bf   :  { %v667_v27 = vpop.f32.mrf.mxu0 }
 0x6c0   :  { %v1354_v40 = vadd.f32 %v667_v27, %v57_v4 }
 0x6c2   :  { %v1360_v5 = vmul.f32 0.70710677, %v1354_v40  ;;  %v673_v33 = vmul.f32 0.5, %v1354_v40  ;;  %v58_v40 = vld [vmem:[%s1391_s2 + $0x3f] ss:$0 sm:$0xff]  ;;  %s930_s2 = smov 128  }
 0x6c4   :  { %v677_v28 = vand.u32 2147483647, %v1360_v5  ;;  %vm743_vm15 = vcmp.lt.f32.partialorder %v1360_v5, 0.0 }
 0x6c6   :  { %v679_v34 = vmul.f32 0.3275911, %v677_v28  ;;  %v731_v36 = vsub.f32 0.0, %v677_v28 }
 0x6c7   :  { %v670_v6 = vpop.f32.mrf.mxu0 }
 0x6c8   :  { %v681_v8 = vadd.f32 1.0, %v679_v34  ;;  %v1366_v9 = vadd.f32 %v670_v6, %v57_v4  ;;  %v733_v7 = vmul.f32 %v731_v36, %v677_v28 }
 0x6ca   :  { %891 = vrcp.f32 %v681_v8  ;;  %v1372_v60 = vmul.f32 0.70710677, %v1366_v9  ;;  %v694_v22 = vand.u32 2147483648, %v681_v8  ;;  %v692_v25 = vand.u32 2147483647, %v681_v8 }
 0x6cb   :  { %vm688_vm8 = vweird.f32 %v681_v8  ;;  %v735_v49 = vmul.f32 1.442695, %v733_v7 }
 0x6cc   :  { %v678_v13 = vand.u32 2147483647, %v1372_v60  ;;  %v695_v29 = vor.u32 1.1754944e-38, %v694_v22  ;;  %vm693_vm10 = vcmp.eq.f32.partialorder %v692_v25, 8.507059e+37  ;;  %vm744_vm1 = vcmp.lt.f32.partialorder %v1372_v60, 0.0 }
 0x6ce   :  { %v680_v15 = vmul.f32 0.3275911, %v678_v13  ;;  %v732_v59 = vsub.f32 0.0, %v678_v13 }
 0x6d0   :  { %v892_v19 = vpop.eup %891  ;;  %v682_v17 = vadd.f32 1.0, %v680_v15  ;;  %v734_v52 = vmul.f32 %v732_v59, %v678_v13 }
 0x6d1   :  { %v684_v32 = vmul.f32 %v892_v19, %v681_v8  ;;  %vm689_vm7 = vweird.f32 %v892_v19 }
 0x6d2   :  { %893 = vrcp.f32 %v682_v17  ;;  %vm690_vm9 = vmor %vm688_vm8, %vm689_vm7  ;;  %v709_v12 = vand.u32 2147483648, %v682_v17  ;;  %v707_v44 = vand.u32 2147483647, %v682_v17  ;;  %vm703_vm12 = vweird.f32 %v682_v17 }
 0x6d3   :  { %v685_v21 = vsub.f32 1.0, %v684_v32  ;;  %895 = vpow2.f32 %v735_v49  ;;  %v737_v56 = vmul.f32 1.442695, %v734_v52 }
 0x6d4   :  { %v710_v48 = vor.u32 1.1754944e-38, %v709_v12  ;;  %vm708_vm14 = vcmp.eq.f32.partialorder %v707_v44, 8.507059e+37 }
 0x6d5   :  { %v686_v23 = vmul.f32 %v892_v19, %v685_v21  ;;  %897 = vpow2.f32 %v737_v56 }
 0x6d7   :  { %v687_v0 = vadd.f32 %v892_v19, %v686_v23 }
 0x6d8   :  { %v894_v30 = vpop.eup %893 }
 0x6d9   :  { %v691_v31 = vsel %vm690_vm9, %v892_v19, %v687_v0  ;;  %v699_v2 = vmul.f32 %v894_v30, %v682_v17  ;;  %vm704_vm11 = vweird.f32 %v894_v30  ;;  %v896_v58 = vpop.eup %895  ;;  %v674_v19 = vmul.f32 0.5, %v1366_v9 }
 0x6da   :  { %v696_v37 = vsel %vm693_vm10, %v695_v29, %v691_v31  ;;  %vm705_vm13 = vmor %vm703_vm12, %vm704_vm11 }
 0x6db   :  { %v713_v38 = vmul.f32 1.0614054, %v696_v37  ;;  %v700_v39 = vsub.f32 1.0, %v699_v2  ;;  %v898_v34 = vpop.eup %897 }
 0x6dd   :  { %v822_v42 = vadd.f32 -1.4531521, %v713_v38  ;;  %v701_v43 = vmul.f32 %v894_v30, %v700_v39 }
 0x6df   :  { %v717_v45 = vmul.f32 %v822_v42, %v696_v37  ;;  %v702_v46 = vadd.f32 %v894_v30, %v701_v43 }
 0x6e1   :  { %v719_v47 = vadd.f32 1.4214138, %v717_v45  ;;  %v706_v41 = vsel %vm705_vm13, %v894_v30, %v702_v46 }
 0x6e2   :  { %v711_v18 = vsel %vm708_vm14, %v710_v48, %v706_v41 }
 0x6e3   :  { %v721_v14 = vmul.f32 %v719_v47, %v696_v37  ;;  %v714_v35 = vmul.f32 1.0614054, %v711_v18 }
 0x6e5   :  { %v824_v50 = vadd.f32 -0.28449672, %v721_v14  ;;  %v823_v51 = vadd.f32 -1.4531521, %v714_v35 }
 0x6e7   :  { %v725_v53 = vmul.f32 %v824_v50, %v696_v37  ;;  %v718_v10 = vmul.f32 %v823_v51, %v711_v18 }
 0x6e9   :  { %v727_v54 = vadd.f32 0.2548296, %v725_v53  ;;  %v720_v55 = vadd.f32 1.4214138, %v718_v10 }
 0x6eb   :  { %v729_v57 = vmul.f32 %v727_v54, %v696_v37  ;;  %v722_v61 = vmul.f32 %v720_v55, %v711_v18 }
 0x6ed   :  { %v739_v62 = vmul.f32 %v896_v58, %v729_v57  ;;  %v825_v63 = vadd.f32 -0.28449672, %v722_v61 }
 0x6ef   :  { %v741_v3 = vsub.f32 1.0, %v739_v62  ;;  %v726_v26 = vmul.f32 %v825_v63, %v711_v18 }
 0x6f1   :  { %v745_v4 = vsub.f32 0.0, %v741_v3  ;;  %v728_v24 = vadd.f32 0.2548296, %v726_v26 }
 0x6f3   :  { %v747_v27 = vsel %vm743_vm15, %v745_v4, %v741_v3  ;;  %v730_v1 = vmul.f32 %v728_v24, %v711_v18 }
 0x6f4   :  { %v749_v28 = vadd.f32 1.0, %v747_v27 }
 0x6f5   :  { %v740_v8 = vmul.f32 %v898_v34, %v730_v1 }
 0x6f6   :  { %v751_v6 = vmul.f32 %v749_v28, %v673_v33 }
 0x6f7   :  { %v742_v11 = vsub.f32 1.0, %v740_v8 }
 0x6f8   :  { %769 = vmatmul.f32.vlgmr.msrb.gmra.mxu2 %v751_v6 }
 0x6f9   :  { %v746_v13 = vsub.f32 0.0, %v742_v11 }
 0x6fb   :  { %v748_v15 = vsel %vm744_vm1, %v746_v13, %v742_v11 }
 0x6fc   :  { %v750_v32 = vadd.f32 1.0, %v748_v15 }
 0x6fe   :  { %v752_v17 = vmul.f32 %v750_v32, %v674_v19 }
 0x700   :  { %772 = vmatmul.f32.gmra.mxu2 %v752_v17 }
 0x77b   :  { %v770_v5 = vpop.f32.mrf.mxu2 }
 0x77c   :  { %v771_v21 = vadd.f32 %v770_v5, %v58_v40 }
 0x77e   :  { %v776_v22 = vadd.f32 %v771_v21, %v1311_v16 }
 0x780   :  { %778 = vst.msk [vmem:[#allocation2] sm:$0xff] %vm75_vm0, %v776_v22 }
 0x783   :  { %v773_v9 = vpop.f32.mrf.mxu2 }
 0x784   :  { %v774_v60 = vadd.f32 %v773_v9, %v58_v40 }
 0x786   :  { %v777_v23 = vadd.f32 %v774_v60, %v1316_v20 }
 0x788   :  { %779 = vst.msk [vmem:[#allocation2 + $0x8] sm:$0xff] %vm75_vm0, %v777_v23 }
 0x789   :  { %792 = dma.vmem_to_hbm [thread:$0]  %s785_s22, 256, %s787_s26, [#allocation3], %s930_s2, %s930_s2, %s931_s27  }
 0x78a   :  { %923 = dma.done.wait [#allocation3], 256  }
 0x78b   :  { %924 = vsyncadd [#allocation3], 4294967040 }
 0x78c   :  { %797 = vsyncpa [#allocation3], 1 }

</bundles_post_ra>
